<compile_context>
chip_gen: v7x
topology: tpu7x:2x2x1
jax: 0.10.0
libtpu: 0.0.40
codegen_flags: <defaults>
</compile_context>

<pallas_src>
import jax
import jax.numpy as jnp
from jax.experimental import pallas as pl
from jax.experimental.pallas import tpu as pltpu

EPS = 1e-5


def _vmem_capacity_bytes():
    """Best-effort VMEM capacity query (v5e/v6e: 128 MiB, v7x: 64 MiB)."""
    try:
        return int(pltpu.get_tpu_info().vmem_capacity_bytes)
    except Exception:
        return 64 * 1024 * 1024  # conservative (v7x-safe) fallback


def _pick_tile_hw(hw, itemsize, c, max_block_bytes):
    """Largest divisor of hw (spatial elems per channel) fitting the budget.

    Prefers lane-aligned (multiple-of-128) tiles when hw is 128-aligned; never
    returns a tile larger than the budget, so non-128-divisible HW cannot blow
    the VMEM limit.
    """
    cap = max(1, max_block_bytes // (c * itemsize))
    if hw <= cap:
        return hw
    if hw % 128 == 0 and cap >= 128:
        t = (cap // 128) * 128
        while hw % t:
            t -= 128
        return t
    for t in range(min(cap, hw - 1), 0, -1):
        if hw % t == 0:
            return t
    return 1  # unreachable


def _sum_pool_kernel(x_ref, o_ref):
    # x_ref: (C, tile_hw)  current spatial tile (channels on sublanes).
    # o_ref: (C, L) f32    lane-dense partial-sum accumulator; the output
    #                      block itself, resident across the inner grid axis,
    #                      written back to HBM once per (batch, split).
    t = pl.program_id(2)

    @pl.when(t == 0)
    def _init():
        o_ref[...] = jnp.zeros_like(o_ref)

    c, thw = x_ref.shape
    n_full = thw // 128
    # Lane-preserving accumulate: static 128-wide lane-group slices of the
    # input feed pure VALU adds into the (C, 128) accumulator.  No XLU work
    # in the hot loop; the kernel stays DMA-bound.
    for k in range(n_full):
        o_ref[...] += x_ref[:, k * 128:(k + 1) * 128].astype(jnp.float32)
    rem = thw - n_full * 128
    if rem:
        o_ref[:, :rem] += x_ref[:, n_full * 128:].astype(jnp.float32)


def spectacle_detect(x_nchw, gamma, beta, running_mean, running_var,
                     lin_w, lin_b, eps=EPS):
    """SpectacleDetectModule forward.

    Args:
      x_nchw: (B, 512, H, W) feature map (f32 or bf16).
      gamma, beta, running_mean, running_var: (512,) BatchNorm2d params.
      lin_w: (2, 512) Linear weight (PyTorch out x in).
      lin_b: (2,) Linear bias.
    Returns:
      (logits (B, 2) f32, embedding (B, 512) f32)
    """
    B, C, H, W = x_nchw.shape
    HW = H * W

    # Free contiguous view: NCHW -> (B, C, HW). No HBM layout pass.
    x = x_nchw.reshape(B, C, HW)
    itemsize = jnp.dtype(x.dtype).itemsize

    # Generation-aware tile budget / VMEM limit.
    vmem_cap = _vmem_capacity_bytes()
    if vmem_cap <= 64 * 1024 * 1024:          # v7x: 64 MiB VMEM
        max_block_bytes = 6 * 1024 * 1024
    else:                                     # v5e / v6e: 128 MiB VMEM
        max_block_bytes = 10 * 1024 * 1024
    vmem_limit = min(vmem_cap // 2, 64 * 1024 * 1024)

    tile_hw = _pick_tile_hw(HW, itemsize, C, max_block_bytes)
    n_tiles = HW // tile_hw
    acc_lanes = min(128, tile_hw)

    # When the batch alone cannot feed both v7x TensorCores, split the spatial
    # reduction into two "parallel" chunks (partial sums combined in wrapper).
    n_split = 2 if (B < 2 and n_tiles >= 2 and n_tiles % 2 == 0) else 1
    tiles_per_split = n_tiles // n_split

    cost = pl.CostEstimate(
        flops=int(B * C * HW),
        transcendentals=0,
        bytes_accessed=int(B * C * HW * itemsize
                           + B * n_split * C * acc_lanes * 4),
    )

    # NOTE: on v7x with very small tiles, pipeline_mode=pl.Buffered(3) on the
    # x BlockSpec is a cheap knob to hide batch-boundary bubbles.
    partial = pl.pallas_call(
        _sum_pool_kernel,
        grid=(B, n_split, tiles_per_split),
        in_specs=[
            pl.BlockSpec((None, C, tile_hw),
                         lambda b, s, t: (b, 0, s * tiles_per_split + t)),
        ],
        out_specs=pl.BlockSpec((None, None, C, acc_lanes),
                               lambda b, s, t: (b, s, 0, 0)),
        out_shape=jax.ShapeDtypeStruct((B, n_split, C, acc_lanes), jnp.float32),
        compiler_params=pltpu.CompilerParams(
            dimension_semantics=("parallel", "parallel", "arbitrary"),
            vmem_limit_bytes=vmem_limit,
        ),
        cost_estimate=cost,
    )(x)

    # Tiny per-batch epilogue in plain JAX (hoisted out of the kernel): the
    # single cross-lane / cross-split reduce, the BN-after-pooling affine
    # (exact commutation since the spatial mean is linear), and Linear(512,2).
    sums = jnp.sum(partial, axis=(1, 3))                                # (B, C)
    inv_std = 1.0 / jnp.sqrt(running_var.astype(jnp.float32) + eps)
    scale = gamma.astype(jnp.float32) * inv_std
    shift = beta.astype(jnp.float32) - running_mean.astype(jnp.float32) * scale
    emb = sums * (scale / HW)[None, :] + shift[None, :]                 # (B, C)
    logits = emb @ lin_w.astype(jnp.float32).T + lin_b.astype(jnp.float32)[None, :]
    return logits, emb


def _reference(x_nchw, gamma, beta, running_mean, running_var, lin_w, lin_b,
               eps=EPS):
    # Pure-JAX reference matching PyTorch eval semantics.
    inv_std = 1.0 / jnp.sqrt(running_var + eps)
    xn = (x_nchw - running_mean[None, :, None, None]) * inv_std[None, :, None, None]
    xn = xn * gamma[None, :, None, None] + beta[None, :, None, None]
    emb = jnp.mean(xn, axis=(2, 3))                 # (B, 512)
    logits = emb @ lin_w.T + lin_b[None, :]
    return logits, emb


if __name__ == "__main__":
    B, C, H, W = 2, 512, 8, 8
    OUT = 2

    key = jax.random.PRNGKey(0)
    ks = jax.random.split(key, 7)

    x = jax.random.normal(ks[0], (B, C, H, W), dtype=jnp.float32)

    # Deterministic synthetic parameters (no checkpoint load).
    gamma = 1.0 + 0.1 * jax.random.normal(ks[1], (C,), dtype=jnp.float32)
    beta = 0.1 * jax.random.normal(ks[2], (C,), dtype=jnp.float32)
    running_mean = 0.05 * jax.random.normal(ks[3], (C,), dtype=jnp.float32)
    running_var = 1.0 + 0.1 * jax.random.uniform(ks[4], (C,), dtype=jnp.float32)
    lin_w = 0.02 * jax.random.normal(ks[5], (OUT, C), dtype=jnp.float32)
    lin_b = 0.01 * jax.random.normal(ks[6], (OUT,), dtype=jnp.float32)

    ref_logits, ref_emb = _reference(x, gamma, beta, running_mean, running_var,
                                     lin_w, lin_b)

    # f32 feature map: matches PyTorch f32 eval numerics.
    logits, emb = spectacle_detect(x, gamma, beta, running_mean, running_var,
                                   lin_w, lin_b)
    jax.block_until_ready((logits, emb))
    assert logits.shape == (B, OUT) and emb.shape == (B, C)
    assert logits.dtype == jnp.float32 and emb.dtype == jnp.float32
    assert jnp.allclose(logits, ref_logits, atol=1e-4, rtol=1e-4)
    assert jnp.allclose(emb, ref_emb, atol=1e-4, rtol=1e-4)

    # bf16 feature map (bandwidth-optimized path): outputs remain f32.
    logits_bf, emb_bf = spectacle_detect(x.astype(jnp.bfloat16), gamma, beta,
                                         running_mean, running_var, lin_w, lin_b)
    jax.block_until_ready((logits_bf, emb_bf))
    assert logits_bf.dtype == jnp.float32 and emb_bf.dtype == jnp.float32
    assert jnp.allclose(emb_bf, ref_emb, atol=5e-2, rtol=5e-2)
    assert jnp.allclose(logits_bf, ref_logits, atol=5e-2, rtol=5e-2)

    print("KERNEL_OK")
</pallas_src>

<mosaic_0001>
module attributes {stable_mosaic.version = 11 : i64} {
  func.func @_sum_pool_kernel(%arg0: i32, %arg1: i32, %arg2: i32, %arg3: memref<1x512x64xf32, #tpu.memory_space<vmem>>, %arg4: memref<1x1x512x64xf32, #tpu.memory_space<vmem>>) attributes {dimension_semantics = [#tpu.dimension_semantics<parallel>, #tpu.dimension_semantics<parallel>, #tpu.dimension_semantics<arbitrary>], iteration_bounds = array<i64: 2, 1, 1>, scalar_prefetch = 0 : i64, scratch_operands = 0 : i64, tpu.core_type = #tpu.core_type<tc>, window_params = [{transform_indices = @transform_0, window_bounds = array<i64: 1, 512, 64>}, {transform_indices = @transform_1, window_bounds = array<i64: 1, 1, 512, 64>}]} {
    %c0_i32 = arith.constant 0 : i32
    %0 = arith.cmpi eq, %arg2, %c0_i32 : i32
    %1 = arith.extui %0 : i1 to i32
    %c0_i32_0 = arith.constant 0 : i32
    %2 = arith.cmpi ne, %1, %c0_i32_0 : i32
    scf.if %2 {
      %cst = arith.constant 0.000000e+00 : f32
      %11 = vector.broadcast %cst : f32 to vector<512x64xf32>
      %c0_11 = arith.constant 0 : index
      %c0_12 = arith.constant 0 : index
      %c0_13 = arith.constant 0 : index
      %c0_14 = arith.constant 0 : index
      %12 = vector.load %arg4[%c0_11, %c0_12, %c0_13, %c0_14] : memref<1x1x512x64xf32, #tpu.memory_space<vmem>>, vector<1x1x512x64xf32>
      %13 = vector.shape_cast %12 : vector<1x1x512x64xf32> to vector<512x64xf32>
      %14 = vector.shape_cast %11 : vector<512x64xf32> to vector<1x1x512x64xf32>
      tpu.vector_store %arg4[%c0_11, %c0_12, %c0_13, %c0_14], %14 {strides = array<i32>} : memref<1x1x512x64xf32, #tpu.memory_space<vmem>>, vector<1x1x512x64xf32>,
    } else {
    }
    %c0 = arith.constant 0 : index
    %c0_1 = arith.constant 0 : index
    %c0_2 = arith.constant 0 : index
    %c0_3 = arith.constant 0 : index
    %3 = vector.load %arg4[%c0, %c0_1, %c0_2, %c0_3] : memref<1x1x512x64xf32, #tpu.memory_space<vmem>>, vector<1x1x512x64xf32>
    %4 = vector.shape_cast %3 : vector<1x1x512x64xf32> to vector<512x64xf32>
    %c0_4 = arith.constant 0 : index
    %c0_5 = arith.constant 0 : index
    %c0_6 = arith.constant 0 : index
    %5 = vector.load %arg3[%c0_4, %c0_5, %c0_6] : memref<1x512x64xf32, #tpu.memory_space<vmem>>, vector<1x512x64xf32>
    %6 = vector.shape_cast %5 : vector<1x512x64xf32> to vector<512x64xf32>
    %7 = arith.addf %4, %6 : vector<512x64xf32>
    %c0_7 = arith.constant 0 : index
    %c0_8 = arith.constant 0 : index
    %c0_9 = arith.constant 0 : index
    %c0_10 = arith.constant 0 : index
    %8 = vector.load %arg4[%c0_7, %c0_8, %c0_9, %c0_10] : memref<1x1x512x64xf32, #tpu.memory_space<vmem>>, vector<1x1x512x64xf32>
    %9 = vector.shape_cast %8 : vector<1x1x512x64xf32> to vector<512x64xf32>
    %10 = vector.shape_cast %7 : vector<512x64xf32> to vector<1x1x512x64xf32>
    tpu.vector_store %arg4[%c0_7, %c0_8, %c0_9, %c0_10], %10 {strides = array<i32>} : memref<1x1x512x64xf32, #tpu.memory_space<vmem>>, vector<1x1x512x64xf32>,
    return
  }
  func.func @transform_0(%arg0: i32, %arg1: i32, %arg2: i32) -> (i32, i32, i32) {
    %c1_i32 = arith.constant 1 : i32
    %0 = arith.muli %arg1, %c1_i32 : i32
    %1 = arith.addi %0, %arg2 : i32
    %c0_i32 = arith.constant 0 : i32
    %c0_i32_0 = arith.constant 0 : i32
    return %arg0, %c0_i32, %1 : i32, i32, i32
  }
  func.func @transform_1(%arg0: i32, %arg1: i32, %arg2: i32) -> (i32, i32, i32, i32) {
    %c0_i32 = arith.constant 0 : i32
    %c0_i32_0 = arith.constant 0 : i32
    %c0_i32_1 = arith.constant 0 : i32
    return %arg0, %arg1, %c0_i32, %c0_i32_0 : i32, i32, i32, i32
  }
}

</mosaic_0001>

<bundles_post_ra>
// kernel: tpu_custom_call.1
= control target key start
LH: loop header
LB: loop body
LE: loop exit
PB: predicated region body
PF: predicated region fallthrough
CT: control target
= control target key end

     0   :  { %s655_s6 = smov 0   ;;  %s657_s7 = smov 0   ;;  %s1147_s0 = inlined_call_operand.vmem [shape: f32[2,512,64], index: 0, kind: input, shape index: {}]   ;;  %s1148_s1 = inlined_call_operand.vmem [shape: f32[2,1,512,64], index: 1, kind: output, shape index: {}]  }
   0x1   :  { %s659_s8 = smov 0  }
   0x2 LB: > { %s30_s9 = sadd.s32 1, %s638_s7  ;;  %p586_p0 = scmp.ge.s32.totalorder %s642_s8, 1  ;;  %s642_s8 = sphi %s659_s8, %s11_s8   ;;  %s638_s7 = sphi %s657_s7, %s1150_s7   ;;  %s634_s6 = sphi %s655_s6, %s1149_s6  }
   0x3   : > { %p32_p1 = scmp.ge.s32.totalorder %s30_s9, 2  ;;  %p117_p2 = scmp.lt.s32.totalorder %s642_s8, 3 }
   0x5   : > { %s1152_s9 = smov (%p32_p1, %s30_s9), 0  ;;  %p118_p3 = pnand %p586_p0, %p117_p2 }
   0x6   : > { %p146_p4 = scmp.lt.s32.totalorder (!%p118_p3), %s634_s6, 1  ;;  %vm168_vm0 = vcmask (!%p118_p3), 523264   ;;  %v644_v0 = vmov (!%p118_p3), 0.0  }
   0x7   : > { %121 = sbr.rel (%p118_p3) target bundleno = 84 (0x54), region = 24 }
   0xe   : > { %s1154_s6 = smov (!%p146_p4, %s634_s6), 1 }
   0xf   : > { %s593_s10 = sshll.u32 %s1154_s6, 9 }
  0x10   : > { %s681_s13 = scalar_lea.vmem %s1148_s1, %s593_s10  ;;  %s880_s16 = scalar_lea.vmem %s1147_s0, %s593_s10 }
  0x11   : > { %169 = vst.msk [vmem:[%s681_s13] sm:$0xff] %vm168_vm0, %v644_v0  ;;  %170 = vst.msk [vmem:[%s681_s13 + $0x8] sm:$0xff] %vm168_vm0, %v644_v0  ;;  %v297_v1 = vld [vmem:[%s880_s16] sm:$0xff]  ;;  %v298_v2 = vld [vmem:[%s880_s16 + $0x8] sm:$0xff] }
  0x12   : > { %171 = vst.msk [vmem:[%s681_s13 + $0x10] sm:$0xff] %vm168_vm0, %v644_v0  ;;  %172 = vst.msk [vmem:[%s681_s13 + $0x18] sm:$0xff] %vm168_vm0, %v644_v0  ;;  %v299_v3 = vld [vmem:[%s880_s16 + $0x10] sm:$0xff]  ;;  %v300_v4 = vld [vmem:[%s880_s16 + $0x18] sm:$0xff] }
  0x13   : > { %173 = vst.msk [vmem:[%s681_s13 + $0x20] sm:$0xff] %vm168_vm0, %v644_v0  ;;  %174 = vst.msk [vmem:[%s681_s13 + $0x28] sm:$0xff] %vm168_vm0, %v644_v0  ;;  %v301_v5 = vld [vmem:[%s880_s16 + $0x20] sm:$0xff]  ;;  %v302_v6 = vld [vmem:[%s880_s16 + $0x28] sm:$0xff] }
  0x14   : > { %175 = vst.msk [vmem:[%s681_s13 + $0x30] sm:$0xff] %vm168_vm0, %v644_v0  ;;  %176 = vst.msk [vmem:[%s681_s13 + $0x38] sm:$0xff] %vm168_vm0, %v644_v0  ;;  %v303_v7 = vld [vmem:[%s880_s16 + $0x30] sm:$0xff]  ;;  %v304_v8 = vld [vmem:[%s880_s16 + $0x38] sm:$0xff] }
  0x15   : > { %177 = vst.msk [vmem:[%s681_s13 + $0x40] sm:$0xff] %vm168_vm0, %v644_v0  ;;  %178 = vst.msk [vmem:[%s681_s13 + $0x48] sm:$0xff] %vm168_vm0, %v644_v0  ;;  %v305_v9 = vld [vmem:[%s880_s16 + $0x40] sm:$0xff]  ;;  %v306_v10 = vld [vmem:[%s880_s16 + $0x48] sm:$0xff] }
  0x16   : > { %179 = vst.msk [vmem:[%s681_s13 + $0x50] sm:$0xff] %vm168_vm0, %v644_v0  ;;  %180 = vst.msk [vmem:[%s681_s13 + $0x58] sm:$0xff] %vm168_vm0, %v644_v0  ;;  %v307_v11 = vld [vmem:[%s880_s16 + $0x50] sm:$0xff]  ;;  %v308_v12 = vld [vmem:[%s880_s16 + $0x58] sm:$0xff] }
  0x17   : > { %181 = vst.msk [vmem:[%s681_s13 + $0x60] sm:$0xff] %vm168_vm0, %v644_v0  ;;  %182 = vst.msk [vmem:[%s681_s13 + $0x68] sm:$0xff] %vm168_vm0, %v644_v0  ;;  %v309_v16 = vld [vmem:[%s880_s16 + $0x60] sm:$0xff]  ;;  %v310_v17 = vld [vmem:[%s880_s16 + $0x68] sm:$0xff] }
  0x18   : > { %183 = vst.msk [vmem:[%s681_s13 + $0x70] sm:$0xff] %vm168_vm0, %v644_v0  ;;  %184 = vst.msk [vmem:[%s681_s13 + $0x78] sm:$0xff] %vm168_vm0, %v644_v0  ;;  %v233_v13 = vld [vmem:[%s681_s13] sm:$0xff]  ;;  %v234_v14 = vld [vmem:[%s681_s13 + $0x8] sm:$0xff] }
  0x19   : > { %185 = vst.msk [vmem:[%s681_s13 + $0x80] sm:$0xff] %vm168_vm0, %v644_v0  ;;  %186 = vst.msk [vmem:[%s681_s13 + $0x88] sm:$0xff] %vm168_vm0, %v644_v0  ;;  %v235_v15 = vld [vmem:[%s681_s13 + $0x10] sm:$0xff]  ;;  %v361_v19 = vadd.f32 %v297_v1, %v233_v13  ;;  %v362_v20 = vadd.f32 %v298_v2, %v234_v14  ;;  %v236_v22 = vld [vmem:[%s681_s13 + $0x18] sm:$0xff] }
  0x1a   : > { %187 = vst.msk [vmem:[%s681_s13 + $0x90] sm:$0xff] %vm168_vm0, %v644_v0  ;;  %188 = vst.msk [vmem:[%s681_s13 + $0x98] sm:$0xff] %vm168_vm0, %v644_v0  ;;  %v311_v18 = vld [vmem:[%s880_s16 + $0x70] sm:$0xff]  ;;  %v363_v21 = vadd.f32 %v299_v3, %v235_v15  ;;  %v237_v23 = vld [vmem:[%s681_s13 + $0x20] sm:$0xff]  ;;  %v364_v28 = vadd.f32 %v300_v4, %v236_v22 }
  0x1b   : > { %189 = vst.msk [vmem:[%s681_s13 + $0xa0] sm:$0xff] %vm168_vm0, %v644_v0  ;;  %190 = vst.msk [vmem:[%s681_s13 + $0xa8] sm:$0xff] %vm168_vm0, %v644_v0  ;;  %v238_v24 = vld [vmem:[%s681_s13 + $0x28] sm:$0xff]  ;;  %v312_v25 = vld [vmem:[%s880_s16 + $0x78] sm:$0xff]  ;;  %v365_v29 = vadd.f32 %v301_v5, %v237_v23 }
  0x1c   : > { %191 = vst.msk [vmem:[%s681_s13 + $0xb0] sm:$0xff] %vm168_vm0, %v644_v0  ;;  %192 = vst.msk [vmem:[%s681_s13 + $0xb8] sm:$0xff] %vm168_vm0, %v644_v0  ;;  %v313_v26 = vld [vmem:[%s880_s16 + $0x80] sm:$0xff]  ;;  %v314_v27 = vld [vmem:[%s880_s16 + $0x88] sm:$0xff]  ;;  %v366_v30 = vadd.f32 %v302_v6, %v238_v24 }
  0x1d   : > { %193 = vst.msk [vmem:[%s681_s13 + $0xc0] sm:$0xff] %vm168_vm0, %v644_v0  ;;  %194 = vst.msk [vmem:[%s681_s13 + $0xc8] sm:$0xff] %vm168_vm0, %v644_v0  ;;  %v239_v31 = vld [vmem:[%s681_s13 + $0x30] sm:$0xff]  ;;  %v240_v32 = vld [vmem:[%s681_s13 + $0x38] sm:$0xff] }
  0x1e   : > { %195 = vst.msk [vmem:[%s681_s13 + $0xd0] sm:$0xff] %vm168_vm0, %v644_v0  ;;  %196 = vst.msk [vmem:[%s681_s13 + $0xd8] sm:$0xff] %vm168_vm0, %v644_v0  ;;  %v241_v33 = vld [vmem:[%s681_s13 + $0x40] sm:$0xff]  ;;  %v315_v34 = vld [vmem:[%s880_s16 + $0x90] sm:$0xff]  ;;  %v367_v37 = vadd.f32 %v303_v7, %v239_v31  ;;  %v368_v38 = vadd.f32 %v304_v8, %v240_v32 }
  0x1f   : > { %197 = vst.msk [vmem:[%s681_s13 + $0xe0] sm:$0xff] %vm168_vm0, %v644_v0  ;;  %198 = vst.msk [vmem:[%s681_s13 + $0xe8] sm:$0xff] %vm168_vm0, %v644_v0  ;;  %v316_v35 = vld [vmem:[%s880_s16 + $0x98] sm:$0xff]  ;;  %v317_v36 = vld [vmem:[%s880_s16 + $0xa0] sm:$0xff]  ;;  %v369_v39 = vadd.f32 %v305_v9, %v241_v33 }
  0x20   : > { %199 = vst.msk [vmem:[%s681_s13 + $0xf0] sm:$0xff] %vm168_vm0, %v644_v0  ;;  %200 = vst.msk [vmem:[%s681_s13 + $0xf8] sm:$0xff] %vm168_vm0, %v644_v0  ;;  %v242_v40 = vld [vmem:[%s681_s13 + $0x48] sm:$0xff]  ;;  %v243_v41 = vld [vmem:[%s681_s13 + $0x50] sm:$0xff] }
  0x21   : > { %201 = vst.msk [vmem:[%s681_s13 + $0x100] sm:$0xff] %vm168_vm0, %v644_v0  ;;  %202 = vst.msk [vmem:[%s681_s13 + $0x108] sm:$0xff] %vm168_vm0, %v644_v0  ;;  %v244_v42 = vld [vmem:[%s681_s13 + $0x58] sm:$0xff]  ;;  %v370_v43 = vadd.f32 %v306_v10, %v242_v40  ;;  %v371_v44 = vadd.f32 %v307_v11, %v243_v41  ;;  %v245_v46 = vld [vmem:[%s681_s13 + $0x60] sm:$0xff] }
  0x22   : > { %203 = vst.msk [vmem:[%s681_s13 + $0x110] sm:$0xff] %vm168_vm0, %v644_v0  ;;  %204 = vst.msk [vmem:[%s681_s13 + $0x118] sm:$0xff] %vm168_vm0, %v644_v0  ;;  %v372_v45 = vadd.f32 %v308_v12, %v244_v42  ;;  %v246_v47 = vld [vmem:[%s681_s13 + $0x68] sm:$0xff]  ;;  %v247_v48 = vld [vmem:[%s681_s13 + $0x70] sm:$0xff]  ;;  %v373_v49 = vadd.f32 %v309_v16, %v245_v46 }
  0x23   : > { %205 = vst.msk [vmem:[%s681_s13 + $0x120] sm:$0xff] %vm168_vm0, %v644_v0  ;;  %206 = vst.msk [vmem:[%s681_s13 + $0x128] sm:$0xff] %vm168_vm0, %v644_v0  ;;  %v374_v50 = vadd.f32 %v310_v17, %v246_v47  ;;  %v375_v51 = vadd.f32 %v311_v18, %v247_v48  ;;  %v248_v52 = vld [vmem:[%s681_s13 + $0x78] sm:$0xff]  ;;  %v249_v53 = vld [vmem:[%s681_s13 + $0x80] sm:$0xff] }
  0x24   : > { %207 = vst.msk [vmem:[%s681_s13 + $0x130] sm:$0xff] %vm168_vm0, %v644_v0  ;;  %208 = vst.msk [vmem:[%s681_s13 + $0x138] sm:$0xff] %vm168_vm0, %v644_v0  ;;  %v250_v54 = vld [vmem:[%s681_s13 + $0x88] sm:$0xff]  ;;  %v376_v55 = vadd.f32 %v312_v25, %v248_v52  ;;  %v377_v56 = vadd.f32 %v313_v26, %v249_v53  ;;  %v251_v58 = vld [vmem:[%s681_s13 + $0x90] sm:$0xff] }
  0x25   : > { %209 = vst.msk [vmem:[%s681_s13 + $0x140] sm:$0xff] %vm168_vm0, %v644_v0  ;;  %210 = vst.msk [vmem:[%s681_s13 + $0x148] sm:$0xff] %vm168_vm0, %v644_v0  ;;  %v378_v57 = vadd.f32 %v314_v27, %v250_v54  ;;  %v252_v59 = vld [vmem:[%s681_s13 + $0x98] sm:$0xff]  ;;  %v253_v60 = vld [vmem:[%s681_s13 + $0xa0] sm:$0xff]  ;;  %v379_v61 = vadd.f32 %v315_v34, %v251_v58 }
  0x26   : > { %211 = vst.msk [vmem:[%s681_s13 + $0x150] sm:$0xff] %vm168_vm0, %v644_v0  ;;  %212 = vst.msk [vmem:[%s681_s13 + $0x158] sm:$0xff] %vm168_vm0, %v644_v0  ;;  %v380_v62 = vadd.f32 %v316_v35, %v252_v59  ;;  %v381_v63 = vadd.f32 %v317_v36, %v253_v60  ;;  %v318_v1 = vld [vmem:[%s880_s16 + $0xa8] sm:$0xff]  ;;  %v255_v2 = vld [vmem:[%s681_s13 + $0xb0] sm:$0xff] }
  0x27   : > { %213 = vst.msk [vmem:[%s681_s13 + $0x160] sm:$0xff] %vm168_vm0, %v644_v0  ;;  %214 = vst.msk [vmem:[%s681_s13 + $0x168] sm:$0xff] %vm168_vm0, %v644_v0  ;;  %v319_v4 = vld [vmem:[%s880_s16 + $0xb0] sm:$0xff]  ;;  %v256_v5 = vld [vmem:[%s681_s13 + $0xb8] sm:$0xff] }
  0x28   : > { %215 = vst.msk [vmem:[%s681_s13 + $0x170] sm:$0xff] %vm168_vm0, %v644_v0  ;;  %216 = vst.msk [vmem:[%s681_s13 + $0x178] sm:$0xff] %vm168_vm0, %v644_v0  ;;  %v320_v6 = vld [vmem:[%s880_s16 + $0xb8] sm:$0xff]  ;;  %v383_v7 = vadd.f32 %v319_v4, %v255_v2  ;;  %v257_v9 = vld [vmem:[%s681_s13 + $0xc0] sm:$0xff] }
  0x29   : > { %217 = vst.msk [vmem:[%s681_s13 + $0x180] sm:$0xff] %vm168_vm0, %v644_v0  ;;  %218 = vst.msk [vmem:[%s681_s13 + $0x188] sm:$0xff] %vm168_vm0, %v644_v0  ;;  %v384_v8 = vadd.f32 %v320_v6, %v256_v5  ;;  %v321_v10 = vld [vmem:[%s880_s16 + $0xc0] sm:$0xff]  ;;  %v258_v11 = vld [vmem:[%s681_s13 + $0xc8] sm:$0xff] }
  0x2a   : > { %219 = vst.msk [vmem:[%s681_s13 + $0x190] sm:$0xff] %vm168_vm0, %v644_v0  ;;  %220 = vst.msk [vmem:[%s681_s13 + $0x198] sm:$0xff] %vm168_vm0, %v644_v0  ;;  %v385_v12 = vadd.f32 %v321_v10, %v257_v9  ;;  %v322_v13 = vld [vmem:[%s880_s16 + $0xc8] sm:$0xff]  ;;  %v259_v14 = vld [vmem:[%s681_s13 + $0xd0] sm:$0xff] }
  0x2b   : > { %221 = vst.msk [vmem:[%s681_s13 + $0x1a0] sm:$0xff] %vm168_vm0, %v644_v0  ;;  %222 = vst.msk [vmem:[%s681_s13 + $0x1a8] sm:$0xff] %vm168_vm0, %v644_v0  ;;  %v323_v15 = vld [vmem:[%s880_s16 + $0xd0] sm:$0xff]  ;;  %v386_v16 = vadd.f32 %v322_v13, %v258_v11  ;;  %v260_v18 = vld [vmem:[%s681_s13 + $0xd8] sm:$0xff] }
  0x2c   : > { %223 = vst.msk [vmem:[%s681_s13 + $0x1b0] sm:$0xff] %vm168_vm0, %v644_v0  ;;  %224 = vst.msk [vmem:[%s681_s13 + $0x1b8] sm:$0xff] %vm168_vm0, %v644_v0  ;;  %v387_v17 = vadd.f32 %v323_v15, %v259_v14  ;;  %v325_v22 = vld [vmem:[%s880_s16 + $0xe0] sm:$0xff]  ;;  %v262_v23 = vld [vmem:[%s681_s13 + $0xe8] sm:$0xff] }
  0x2d   : > { %225 = vst.msk [vmem:[%s681_s13 + $0x1c0] sm:$0xff] %vm168_vm0, %v644_v0  ;;  %226 = vst.msk [vmem:[%s681_s13 + $0x1c8] sm:$0xff] %vm168_vm0, %v644_v0  ;;  %v326_v24 = vld [vmem:[%s880_s16 + $0xe8] sm:$0xff]  ;;  %v263_v27 = vld [vmem:[%s681_s13 + $0xf0] sm:$0xff] }
  0x2e   : > { %227 = vst.msk [vmem:[%s681_s13 + $0x1d0] sm:$0xff] %vm168_vm0, %v644_v0  ;;  %228 = vst.msk [vmem:[%s681_s13 + $0x1d8] sm:$0xff] %vm168_vm0, %v644_v0  ;;  %v390_v26 = vadd.f32 %v326_v24, %v262_v23  ;;  %v328_v31 = vld [vmem:[%s880_s16 + $0xf8] sm:$0xff]  ;;  %v265_v32 = vld [vmem:[%s681_s13 + $0x100] sm:$0xff] }
  0x2f   : > { %229 = vst.msk [vmem:[%s681_s13 + $0x1e0] sm:$0xff] %vm168_vm0, %v644_v0  ;;  %230 = vst.msk [vmem:[%s681_s13 + $0x1e8] sm:$0xff] %vm168_vm0, %v644_v0  ;;  %v329_v33 = vld [vmem:[%s880_s16 + $0x100] sm:$0xff]  ;;  %v266_v36 = vld [vmem:[%s681_s13 + $0x108] sm:$0xff] }
  0x30   : > { %231 = vst.msk [vmem:[%s681_s13 + $0x1f0] sm:$0xff] %vm168_vm0, %v644_v0  ;;  %232 = vst.msk [vmem:[%s681_s13 + $0x1f8] sm:$0xff] %vm168_vm0, %v644_v0  ;;  %v254_v0 = vld [vmem:[%s681_s13 + $0xa8] sm:$0xff]  ;;  %v393_v35 = vadd.f32 %v329_v33, %v265_v32  ;;  %v331_v40 = vld [vmem:[%s880_s16 + $0x110] sm:$0xff] }
  0x31   : > { %426 = vst.msk [vmem:[%s681_s13] sm:$0xff] %vm168_vm0, %v361_v19  ;;  %427 = vst.msk [vmem:[%s681_s13 + $0x8] sm:$0xff] %vm168_vm0, %v362_v20  ;;  %v382_v3 = vadd.f32 %v318_v1, %v254_v0  ;;  %v324_v19 = vld [vmem:[%s880_s16 + $0xd8] sm:$0xff]  ;;  %v261_v20 = vld [vmem:[%s681_s13 + $0xe0] sm:$0xff] }
  0x32   : > { %428 = vst.msk [vmem:[%s681_s13 + $0x10] sm:$0xff] %vm168_vm0, %v363_v21  ;;  %429 = vst.msk [vmem:[%s681_s13 + $0x18] sm:$0xff] %vm168_vm0, %v364_v28  ;;  %v388_v21 = vadd.f32 %v324_v19, %v260_v18  ;;  %v389_v25 = vadd.f32 %v325_v22, %v261_v20  ;;  %v327_v28 = vld [vmem:[%s880_s16 + $0xf0] sm:$0xff]  ;;  %v268_v41 = vld [vmem:[%s681_s13 + $0x118] sm:$0xff] }
  0x33   : > { %430 = vst.msk [vmem:[%s681_s13 + $0x20] sm:$0xff] %vm168_vm0, %v365_v29  ;;  %431 = vst.msk [vmem:[%s681_s13 + $0x28] sm:$0xff] %vm168_vm0, %v366_v30  ;;  %v264_v29 = vld [vmem:[%s681_s13 + $0xf8] sm:$0xff]  ;;  %v391_v30 = vadd.f32 %v327_v28, %v263_v27  ;;  %v333_v46 = vld [vmem:[%s880_s16 + $0x120] sm:$0xff] }
  0x34   : > { %432 = vst.msk [vmem:[%s681_s13 + $0x30] sm:$0xff] %vm168_vm0, %v367_v37  ;;  %433 = vst.msk [vmem:[%s681_s13 + $0x38] sm:$0xff] %vm168_vm0, %v368_v38  ;;  %v392_v34 = vadd.f32 %v328_v31, %v264_v29  ;;  %v330_v37 = vld [vmem:[%s880_s16 + $0x108] sm:$0xff]  ;;  %v267_v38 = vld [vmem:[%s681_s13 + $0x110] sm:$0xff] }
  0x35   : > { %434 = vst.msk [vmem:[%s681_s13 + $0x40] sm:$0xff] %vm168_vm0, %v369_v39  ;;  %435 = vst.msk [vmem:[%s681_s13 + $0x48] sm:$0xff] %vm168_vm0, %v370_v43  ;;  %v394_v39 = vadd.f32 %v330_v37, %v266_v36  ;;  %v332_v42 = vld [vmem:[%s880_s16 + $0x118] sm:$0xff]  ;;  %v395_v43 = vadd.f32 %v331_v40, %v267_v38  ;;  %v270_v47 = vld [vmem:[%s681_s13 + $0x128] sm:$0xff] }
  0x36   : > { %436 = vst.msk [vmem:[%s681_s13 + $0x50] sm:$0xff] %vm168_vm0, %v371_v44  ;;  %437 = vst.msk [vmem:[%s681_s13 + $0x58] sm:$0xff] %vm168_vm0, %v372_v45  ;;  %v396_v44 = vadd.f32 %v332_v42, %v268_v41  ;;  %v269_v45 = vld [vmem:[%s681_s13 + $0x120] sm:$0xff]  ;;  %v272_v54 = vld [vmem:[%s681_s13 + $0x138] sm:$0xff] }
  0x37   : > { %438 = vst.msk [vmem:[%s681_s13 + $0x60] sm:$0xff] %vm168_vm0, %v373_v49  ;;  %439 = vst.msk [vmem:[%s681_s13 + $0x68] sm:$0xff] %vm168_vm0, %v374_v50  ;;  %v397_v48 = vadd.f32 %v333_v46, %v269_v45  ;;  %v334_v49 = vld [vmem:[%s880_s16 + $0x128] sm:$0xff]  ;;  %v271_v50 = vld [vmem:[%s681_s13 + $0x130] sm:$0xff] }
  0x38   : > { %440 = vst.msk [vmem:[%s681_s13 + $0x70] sm:$0xff] %vm168_vm0, %v375_v51  ;;  %441 = vst.msk [vmem:[%s681_s13 + $0x78] sm:$0xff] %vm168_vm0, %v376_v55  ;;  %v335_v51 = vld [vmem:[%s880_s16 + $0x130] sm:$0xff]  ;;  %v398_v52 = vadd.f32 %v334_v49, %v270_v47  ;;  %v336_v55 = vld [vmem:[%s880_s16 + $0x138] sm:$0xff] }
  0x39   : > { %442 = vst.msk [vmem:[%s681_s13 + $0x80] sm:$0xff] %vm168_vm0, %v377_v56  ;;  %443 = vst.msk [vmem:[%s681_s13 + $0x88] sm:$0xff] %vm168_vm0, %v378_v57  ;;  %v399_v53 = vadd.f32 %v335_v51, %v271_v50  ;;  %v273_v56 = vld [vmem:[%s681_s13 + $0x140] sm:$0xff]  ;;  %v400_v57 = vadd.f32 %v336_v55, %v272_v54  ;;  %v274_v59 = vld [vmem:[%s681_s13 + $0x148] sm:$0xff] }
  0x3a   : > { %444 = vst.msk [vmem:[%s681_s13 + $0x90] sm:$0xff] %vm168_vm0, %v379_v61  ;;  %445 = vst.msk [vmem:[%s681_s13 + $0x98] sm:$0xff] %vm168_vm0, %v380_v62  ;;  %v337_v58 = vld [vmem:[%s880_s16 + $0x140] sm:$0xff]  ;;  %v338_v60 = vld [vmem:[%s880_s16 + $0x148] sm:$0xff] }
  0x3b   : > { %446 = vst.msk [vmem:[%s681_s13 + $0xa0] sm:$0xff] %vm168_vm0, %v381_v63  ;;  %447 = vst.msk [vmem:[%s681_s13 + $0xa8] sm:$0xff] %vm168_vm0, %v382_v3  ;;  %v401_v61 = vadd.f32 %v337_v58, %v273_v56  ;;  %v402_v62 = vadd.f32 %v338_v60, %v274_v59  ;;  %v275_v63 = vld [vmem:[%s681_s13 + $0x150] sm:$0xff]  ;;  %v276_v1 = vld [vmem:[%s681_s13 + $0x158] sm:$0xff] }
  0x3c   : > { %448 = vst.msk [vmem:[%s681_s13 + $0xb0] sm:$0xff] %vm168_vm0, %v383_v7  ;;  %449 = vst.msk [vmem:[%s681_s13 + $0xb8] sm:$0xff] %vm168_vm0, %v384_v8  ;;  %v339_v0 = vld [vmem:[%s880_s16 + $0x150] sm:$0xff]  ;;  %v340_v3 = vld [vmem:[%s880_s16 + $0x158] sm:$0xff] }
  0x3d   : > { %450 = vst.msk [vmem:[%s681_s13 + $0xc0] sm:$0xff] %vm168_vm0, %v385_v12  ;;  %451 = vst.msk [vmem:[%s681_s13 + $0xc8] sm:$0xff] %vm168_vm0, %v386_v16  ;;  %v403_v2 = vadd.f32 %v339_v0, %v275_v63  ;;  %v277_v4 = vld [vmem:[%s681_s13 + $0x160] sm:$0xff]  ;;  %v404_v6 = vadd.f32 %v340_v3, %v276_v1  ;;  %v278_v8 = vld [vmem:[%s681_s13 + $0x168] sm:$0xff] }
  0x3e   : > { %452 = vst.msk [vmem:[%s681_s13 + $0xd0] sm:$0xff] %vm168_vm0, %v387_v17  ;;  %453 = vst.msk [vmem:[%s681_s13 + $0xd8] sm:$0xff] %vm168_vm0, %v388_v21  ;;  %v341_v5 = vld [vmem:[%s880_s16 + $0x160] sm:$0xff]  ;;  %v342_v9 = vld [vmem:[%s880_s16 + $0x168] sm:$0xff] }
  0x3f   : > { %454 = vst.msk [vmem:[%s681_s13 + $0xe0] sm:$0xff] %vm168_vm0, %v389_v25  ;;  %455 = vst.msk [vmem:[%s681_s13 + $0xe8] sm:$0xff] %vm168_vm0, %v390_v26  ;;  %v405_v7 = vadd.f32 %v341_v5, %v277_v4  ;;  %v279_v10 = vld [vmem:[%s681_s13 + $0x170] sm:$0xff]  ;;  %v406_v11 = vadd.f32 %v342_v9, %v278_v8  ;;  %v280_v13 = vld [vmem:[%s681_s13 + $0x178] sm:$0xff] }
  0x40   : > { %456 = vst.msk [vmem:[%s681_s13 + $0xf0] sm:$0xff] %vm168_vm0, %v391_v30  ;;  %457 = vst.msk [vmem:[%s681_s13 + $0xf8] sm:$0xff] %vm168_vm0, %v392_v34  ;;  %v343_v12 = vld [vmem:[%s880_s16 + $0x170] sm:$0xff]  ;;  %v344_v14 = vld [vmem:[%s880_s16 + $0x178] sm:$0xff] }
  0x41   : > { %458 = vst.msk [vmem:[%s681_s13 + $0x100] sm:$0xff] %vm168_vm0, %v393_v35  ;;  %459 = vst.msk [vmem:[%s681_s13 + $0x108] sm:$0xff] %vm168_vm0, %v394_v39  ;;  %v407_v15 = vadd.f32 %v343_v12, %v279_v10  ;;  %v408_v16 = vadd.f32 %v344_v14, %v280_v13  ;;  %v281_v17 = vld [vmem:[%s681_s13 + $0x180] sm:$0xff]  ;;  %v282_v19 = vld [vmem:[%s681_s13 + $0x188] sm:$0xff] }
  0x42   : > { %460 = vst.msk [vmem:[%s681_s13 + $0x110] sm:$0xff] %vm168_vm0, %v395_v43  ;;  %461 = vst.msk [vmem:[%s681_s13 + $0x118] sm:$0xff] %vm168_vm0, %v396_v44  ;;  %v345_v18 = vld [vmem:[%s880_s16 + $0x180] sm:$0xff]  ;;  %v346_v21 = vld [vmem:[%s880_s16 + $0x188] sm:$0xff] }
  0x43   : > { %462 = vst.msk [vmem:[%s681_s13 + $0x120] sm:$0xff] %vm168_vm0, %v397_v48  ;;  %463 = vst.msk [vmem:[%s681_s13 + $0x128] sm:$0xff] %vm168_vm0, %v398_v52  ;;  %v409_v20 = vadd.f32 %v345_v18, %v281_v17  ;;  %v283_v22 = vld [vmem:[%s681_s13 + $0x190] sm:$0xff]  ;;  %v410_v24 = vadd.f32 %v346_v21, %v282_v19  ;;  %v284_v26 = vld [vmem:[%s681_s13 + $0x198] sm:$0xff] }
  0x44   : > { %464 = vst.msk [vmem:[%s681_s13 + $0x130] sm:$0xff] %vm168_vm0, %v399_v53  ;;  %465 = vst.msk [vmem:[%s681_s13 + $0x138] sm:$0xff] %vm168_vm0, %v400_v57  ;;  %v347_v23 = vld [vmem:[%s880_s16 + $0x190] sm:$0xff]  ;;  %v348_v27 = vld [vmem:[%s880_s16 + $0x198] sm:$0xff] }
  0x45   : > { %466 = vst.msk [vmem:[%s681_s13 + $0x140] sm:$0xff] %vm168_vm0, %v401_v61  ;;  %467 = vst.msk [vmem:[%s681_s13 + $0x148] sm:$0xff] %vm168_vm0, %v402_v62  ;;  %v411_v25 = vadd.f32 %v347_v23, %v283_v22  ;;  %v285_v28 = vld [vmem:[%s681_s13 + $0x1a0] sm:$0xff]  ;;  %v412_v29 = vadd.f32 %v348_v27, %v284_v26  ;;  %v286_v31 = vld [vmem:[%s681_s13 + $0x1a8] sm:$0xff] }
  0x46   : > { %468 = vst.msk [vmem:[%s681_s13 + $0x150] sm:$0xff] %vm168_vm0, %v403_v2  ;;  %469 = vst.msk [vmem:[%s681_s13 + $0x158] sm:$0xff] %vm168_vm0, %v404_v6  ;;  %v349_v30 = vld [vmem:[%s880_s16 + $0x1a0] sm:$0xff]  ;;  %v350_v32 = vld [vmem:[%s880_s16 + $0x1a8] sm:$0xff] }
  0x47   : > { %470 = vst.msk [vmem:[%s681_s13 + $0x160] sm:$0xff] %vm168_vm0, %v405_v7  ;;  %471 = vst.msk [vmem:[%s681_s13 + $0x168] sm:$0xff] %vm168_vm0, %v406_v11  ;;  %v413_v33 = vadd.f32 %v349_v30, %v285_v28  ;;  %v414_v34 = vadd.f32 %v350_v32, %v286_v31  ;;  %v287_v35 = vld [vmem:[%s681_s13 + $0x1b0] sm:$0xff]  ;;  %v288_v37 = vld [vmem:[%s681_s13 + $0x1b8] sm:$0xff] }
  0x48   : > { %472 = vst.msk [vmem:[%s681_s13 + $0x170] sm:$0xff] %vm168_vm0, %v407_v15  ;;  %473 = vst.msk [vmem:[%s681_s13 + $0x178] sm:$0xff] %vm168_vm0, %v408_v16  ;;  %v351_v36 = vld [vmem:[%s880_s16 + $0x1b0] sm:$0xff]  ;;  %v352_v39 = vld [vmem:[%s880_s16 + $0x1b8] sm:$0xff] }
  0x49   : > { %474 = vst.msk [vmem:[%s681_s13 + $0x180] sm:$0xff] %vm168_vm0, %v409_v20  ;;  %475 = vst.msk [vmem:[%s681_s13 + $0x188] sm:$0xff] %vm168_vm0, %v410_v24  ;;  %v415_v38 = vadd.f32 %v351_v36, %v287_v35  ;;  %v289_v40 = vld [vmem:[%s681_s13 + $0x1c0] sm:$0xff]  ;;  %v416_v42 = vadd.f32 %v352_v39, %v288_v37  ;;  %v290_v44 = vld [vmem:[%s681_s13 + $0x1c8] sm:$0xff] }
  0x4a   : > { %476 = vst.msk [vmem:[%s681_s13 + $0x190] sm:$0xff] %vm168_vm0, %v411_v25  ;;  %477 = vst.msk [vmem:[%s681_s13 + $0x198] sm:$0xff] %vm168_vm0, %v412_v29  ;;  %v353_v41 = vld [vmem:[%s880_s16 + $0x1c0] sm:$0xff]  ;;  %v354_v45 = vld [vmem:[%s880_s16 + $0x1c8] sm:$0xff] }
  0x4b   : > { %478 = vst.msk [vmem:[%s681_s13 + $0x1a0] sm:$0xff] %vm168_vm0, %v413_v33  ;;  %479 = vst.msk [vmem:[%s681_s13 + $0x1a8] sm:$0xff] %vm168_vm0, %v414_v34  ;;  %v417_v43 = vadd.f32 %v353_v41, %v289_v40  ;;  %v291_v46 = vld [vmem:[%s681_s13 + $0x1d0] sm:$0xff]  ;;  %v418_v47 = vadd.f32 %v354_v45, %v290_v44  ;;  %v292_v49 = vld [vmem:[%s681_s13 + $0x1d8] sm:$0xff] }
  0x4c   : > { %480 = vst.msk [vmem:[%s681_s13 + $0x1b0] sm:$0xff] %vm168_vm0, %v415_v38  ;;  %v355_v48 = vld [vmem:[%s880_s16 + $0x1d0] sm:$0xff]  ;;  %v356_v50 = vld [vmem:[%s880_s16 + $0x1d8] sm:$0xff]  ;;  %481 = vst.msk [vmem:[%s681_s13 + $0x1b8] sm:$0xff] %vm168_vm0, %v416_v42 }
  0x4d   : > { %482 = vst.msk [vmem:[%s681_s13 + $0x1c0] sm:$0xff] %vm168_vm0, %v417_v43  ;;  %v419_v51 = vadd.f32 %v355_v48, %v291_v46  ;;  %v420_v52 = vadd.f32 %v356_v50, %v292_v49  ;;  %v293_v53 = vld [vmem:[%s681_s13 + $0x1e0] sm:$0xff]  ;;  %v294_v55 = vld [vmem:[%s681_s13 + $0x1e8] sm:$0xff]  ;;  %483 = vst.msk [vmem:[%s681_s13 + $0x1c8] sm:$0xff] %vm168_vm0, %v418_v47 }
  0x4e   : > { %v357_v54 = vld [vmem:[%s880_s16 + $0x1e0] sm:$0xff]  ;;  %v358_v57 = vld [vmem:[%s880_s16 + $0x1e8] sm:$0xff]  ;;  %v295_v58 = vld [vmem:[%s681_s13 + $0x1f0] sm:$0xff] }
  0x4f   : > { %v421_v56 = vadd.f32 %v357_v54, %v293_v53  ;;  %v359_v59 = vld [vmem:[%s880_s16 + $0x1f0] sm:$0xff]  ;;  %484 = vst.msk [vmem:[%s681_s13 + $0x1d0] sm:$0xff] %vm168_vm0, %v419_v51  ;;  %485 = vst.msk [vmem:[%s681_s13 + $0x1d8] sm:$0xff] %vm168_vm0, %v420_v52  ;;  %v422_v60 = vadd.f32 %v358_v57, %v294_v55  ;;  %v296_v62 = vld [vmem:[%s681_s13 + $0x1f8] sm:$0xff] }
  0x50   : > { %v423_v61 = vadd.f32 %v359_v59, %v295_v58  ;;  %v360_v63 = vld [vmem:[%s880_s16 + $0x1f8] sm:$0xff] }
  0x51   : > { %486 = vst.msk [vmem:[%s681_s13 + $0x1e0] sm:$0xff] %vm168_vm0, %v421_v56  ;;  %v424_v0 = vadd.f32 %v360_v63, %v296_v62  ;;  %487 = vst.msk [vmem:[%s681_s13 + $0x1e8] sm:$0xff] %vm168_vm0, %v422_v60 }
  0x52   : > { %488 = vst.msk [vmem:[%s681_s13 + $0x1f0] sm:$0xff] %vm168_vm0, %v423_v61 }
  0x53   : > { %489 = vst.msk [vmem:[%s681_s13 + $0x1f8] sm:$0xff] %vm168_vm0, %v424_v0 }
  0x54 PF: > { %s11_s8 = sadd.s32 1, %s642_s8   ;;  %s1149_s6 = smov %s638_s7 }
  0x55   : > { %p8_p5 = scmp.ge.s32.totalorder %s11_s8, 4   ;;  %s1150_s7 = smov %s1152_s9 }
  0x57   :  { %10 = sbr.rel (!%p8_p5) target bundleno = 2 (0x2), region = 58 }

</bundles_post_ra>
